<compile_context>
chip_gen: v7x
topology: tpu7x:2x2x1
jax: 0.10.0
libtpu: 0.0.40
codegen_flags: <defaults>
</compile_context>

<pallas_src>
import functools

import jax
import jax.numpy as jnp
from jax import lax
from jax.experimental import pallas as pl
from jax.experimental.pallas import tpu as pltpu

_EPS = 1e-5
# Explicit scoped-VMEM budget: fits the tile plan below on v7x (64 MiB physical,
# keep <= ~48 MiB live) and is far under v5e/v6e's 128 MiB.  Re-derive if tq/tk
# are grown toward the v6e ceiling.
_VMEM_LIMIT_BYTES = 48 * 1024 * 1024


def _prenorm_attn_kernel(xq_ref, xkv_ref, g_ref, b_ref, wq_ref, wkv_ref, *rest,
                         heads, dim_head, eps, project_out):
    """Fused LayerNorm + flash-style MHSA for one (batch, q-tile, kv-tile) step.

    xq_ref  : (tq, D)        query rows (resident across the KV axis)
    xkv_ref : (tk, D)        key/value rows for this KV step
    g_ref   : (1, D)         LayerNorm gamma
    b_ref   : (1, D)         LayerNorm beta
    wq_ref  : (D, inner)     Q projection, pre-scaled by dh**-0.5
    wkv_ref : (D, 2*inner)   fused [K | V] projection
    wout_ref: (inner, D)     output projection           (only if project_out)
    bout_ref: (1, D)         output projection bias      (only if project_out)
    o_ref   : (tq, D) or (tq, inner)
    q_s     : (H, tq, dh)    scratch: per-head Q (input dtype)
    m_s,l_s : (H, tq, 1)     scratch: online-softmax running max / sum (f32)
    acc_s   : (H, tq, dh)    scratch: un-normalized output accumulator (f32)
    """
    if project_out:
        wout_ref, bout_ref, o_ref, q_s, m_s, l_s, acc_s = rest
    else:
        o_ref, q_s, m_s, l_s, acc_s = rest

    ki = pl.program_id(2)
    nk = pl.num_programs(2)
    tq, D = xq_ref.shape
    tk = xkv_ref.shape[0]
    inner = heads * dim_head
    in_dtype = xq_ref.dtype

    gamma = g_ref[...].astype(jnp.float32)
    beta = b_ref[...].astype(jnp.float32)

    def layernorm(x):
        xf = x.astype(jnp.float32)                    # statistics in f32
        mu = jnp.mean(xf, axis=-1, keepdims=True)
        xc = xf - mu
        var = jnp.mean(xc * xc, axis=-1, keepdims=True)
        return (xc * lax.rsqrt(var + eps) * gamma + beta).astype(in_dtype)

    # ---- q projection + accumulator init: once per q tile ----
    @pl.when(ki == 0)
    def _init():
        xnq = layernorm(xq_ref[...])
        q = jnp.dot(xnq, wq_ref[...], preferred_element_type=jnp.float32)   # (tq, inner), pre-scaled
        q_s[...] = jnp.transpose(q.reshape(tq, heads, dim_head), (1, 0, 2)).astype(in_dtype)
        m_s[...] = jnp.full(m_s.shape, -jnp.inf, dtype=m_s.dtype)
        l_s[...] = jnp.zeros(l_s.shape, dtype=l_s.dtype)
        acc_s[...] = jnp.zeros(acc_s.shape, dtype=acc_s.dtype)

    # ---- fused K/V projection for this KV tile (one MXU fill/drain) ----
    xnk = layernorm(xkv_ref[...])
    kv = jnp.dot(xnk, wkv_ref[...], preferred_element_type=jnp.float32)      # (tk, 2*inner)
    kh = jnp.transpose(kv[:, :inner].reshape(tk, heads, dim_head), (1, 0, 2)).astype(in_dtype)
    vh = jnp.transpose(kv[:, inner:].reshape(tk, heads, dim_head), (1, 0, 2)).astype(in_dtype)

    # ---- online-softmax attention update (scores only (H, tq, tk)) ----
    s = jnp.einsum('hnd,hmd->hnm', q_s[...], kh,
                   preferred_element_type=jnp.float32)                       # (H, tq, tk)
    m_prev = m_s[...]
    m_new = jnp.maximum(m_prev, jnp.max(s, axis=-1, keepdims=True))
    alpha = jnp.exp(m_prev - m_new)
    p = jnp.exp(s - m_new)
    l_s[...] = alpha * l_s[...] + jnp.sum(p, axis=-1, keepdims=True)
    acc_s[...] = alpha * acc_s[...] + jnp.einsum('hnm,hmd->hnd', p.astype(in_dtype), vh,
                                                 preferred_element_type=jnp.float32)
    m_s[...] = m_new

    # ---- finalize on the last KV step ----
    @pl.when(ki == nk - 1)
    def _finalize():
        out = acc_s[...] / l_s[...]                                          # exact divide (once per tile)
        out = jnp.transpose(out, (1, 0, 2)).reshape(tq, inner).astype(in_dtype)   # 'h n d -> n (h d)'
        if project_out:
            # single contraction over inner (>= 512 for real ViT): good MXU K-util
            y = jnp.dot(out, wout_ref[...], preferred_element_type=jnp.float32)
            y = y + bout_ref[...].astype(jnp.float32)
            o_ref[...] = y.astype(o_ref.dtype)
        else:
            o_ref[...] = out.astype(o_ref.dtype)


def prepare_params(w_qkv, w_out, b_out, gamma, beta, *, heads, dim_head):
    """One-time re-layout of torch-layout weights into kernel layout.

    Call OUTSIDE the per-forward path (no HBM-wide transpose per call).
      w_qkv : (3*inner, D) torch Linear weight, rows = q|k|v (head-major)
      w_out : (D, inner)   torch Linear weight
    """
    inner = heads * dim_head
    D = w_qkv.shape[1]
    scale = float(dim_head) ** -0.5
    wdt = w_qkv.dtype

    # Fold the softmax scale into Wq (zero in-kernel VALU cost).
    wq = (w_qkv[:inner].astype(jnp.float32).T * scale).astype(wdt)           # (D, inner)
    wkv = jnp.transpose(w_qkv[inner:], (1, 0))                               # (D, 2*inner) = [K | V]

    params = {
        "gamma": gamma.reshape(1, D),
        "beta": beta.reshape(1, D),
        "wq": wq,
        "wkv": wkv,
    }
    project_out = not (heads == 1 and dim_head == D)
    if project_out:
        params["wout"] = jnp.transpose(w_out, (1, 0))                        # (inner, D)
        params["bout"] = b_out.reshape(1, D)
    return params, project_out


@functools.partial(jax.jit, static_argnames=("heads", "dim_head", "project_out", "tq", "tk"))
def prenorm_attention_forward(x, params, *, heads, dim_head, project_out=True,
                              tq=None, tk=None):
    """x: (B, N, D); params from prepare_params()."""
    B, N, D = x.shape
    inner = heads * dim_head
    out_dim = D if project_out else inner

    # Default tile plan (sweep per generation: smaller on v5e, bigger on v6e).
    if tq is None:
        tq = N if N <= 256 else 256
    if tk is None:
        tk = N if N <= 512 else 512
    assert N % tq == 0 and N % tk == 0, "sequence length must divide tile sizes"
    assert tq == N or tq % 8 == 0
    assert tk == N or tk % 8 == 0

    kernel = functools.partial(_prenorm_attn_kernel, heads=heads, dim_head=dim_head,
                               eps=_EPS, project_out=project_out)

    in_specs = [
        # query rows: same block across the KV axis -> stays resident in VMEM
        pl.BlockSpec((pl.Squeezed(), tq, D), lambda b, qi, ki: (b, qi, 0)),
        # key/value rows: streamed along the KV axis (double-buffered)
        pl.BlockSpec((pl.Squeezed(), tk, D), lambda b, qi, ki: (b, ki, 0)),
        # constant-index params: single-buffered (no point double-buffering)
        pl.BlockSpec((1, D), lambda b, qi, ki: (0, 0), pipeline_mode=pl.Buffered(1)),
        pl.BlockSpec((1, D), lambda b, qi, ki: (0, 0), pipeline_mode=pl.Buffered(1)),
        pl.BlockSpec((D, inner), lambda b, qi, ki: (0, 0), pipeline_mode=pl.Buffered(1)),
        pl.BlockSpec((D, 2 * inner), lambda b, qi, ki: (0, 0), pipeline_mode=pl.Buffered(1)),
    ]
    args = [x, x, params["gamma"], params["beta"], params["wq"], params["wkv"]]
    if project_out:
        in_specs += [
            pl.BlockSpec((inner, D), lambda b, qi, ki: (0, 0), pipeline_mode=pl.Buffered(1)),
            pl.BlockSpec((1, D), lambda b, qi, ki: (0, 0), pipeline_mode=pl.Buffered(1)),
        ]
        args += [params["wout"], params["bout"]]

    return pl.pallas_call(
        kernel,
        out_shape=jax.ShapeDtypeStruct((B, N, out_dim), x.dtype),
        grid_spec=pltpu.PrefetchScalarGridSpec(
            num_scalar_prefetch=0,
            grid=(B, N // tq, N // tk),                 # KV axis last (reduction)
            in_specs=in_specs,
            out_specs=pl.BlockSpec((pl.Squeezed(), tq, out_dim),
                                   lambda b, qi, ki: (b, qi, 0)),
            scratch_shapes=[
                pltpu.VMEM((heads, tq, dim_head), x.dtype),      # q (pre-scaled)
                pltpu.VMEM((heads, tq, 1), jnp.float32),         # running max
                pltpu.VMEM((heads, tq, 1), jnp.float32),         # running sum
                pltpu.VMEM((heads, tq, dim_head), jnp.float32),  # output accumulator
            ]),
        compiler_params=pltpu.CompilerParams(
            dimension_semantics=("parallel", "parallel", "arbitrary"),
            vmem_limit_bytes=_VMEM_LIMIT_BYTES),
    )(*args)


def reference_forward(x, gamma, beta, w_qkv, w_out, b_out, *, heads, dim_head, eps=_EPS):
    """Plain-JAX reference mirroring PyTorch PreNorm(dim, Attention(...))."""
    B, N, D = x.shape
    inner = heads * dim_head
    scale = float(dim_head) ** -0.5

    mu = x.mean(-1, keepdims=True)
    var = ((x - mu) ** 2).mean(-1, keepdims=True)
    xn = (x - mu) / jnp.sqrt(var + eps) * gamma + beta

    qkv = xn @ w_qkv.T
    q, k, v = jnp.split(qkv, 3, axis=-1)

    def to_heads(t):  # 'b n (h d) -> b h n d'
        return t.reshape(B, N, heads, dim_head).transpose(0, 2, 1, 3)

    q, k, v = map(to_heads, (q, k, v))
    dots = jnp.einsum('bhnd,bhmd->bhnm', q, k) * scale
    attn = jax.nn.softmax(dots, axis=-1)
    out = jnp.einsum('bhnm,bhmd->bhnd', attn, v)
    out = out.transpose(0, 2, 1, 3).reshape(B, N, inner)
    if not (heads == 1 and dim_head == D):
        out = out @ w_out.T + b_out
    return out


if __name__ == "__main__":
    # Small shapes consistent with the module; N=16 with tq=tk=8 exercises both
    # the parallel q-tile axis and the online-softmax KV loop (grid = (2,2,2)).
    B, N, D = 2, 16, 32
    heads, dim_head = 2, 32
    inner = heads * dim_head
    tq, tk = 8, 8

    key = jax.random.PRNGKey(0)
    kx, kq, kw, kb, kg, kbt = jax.random.split(key, 6)

    x = jax.random.normal(kx, (B, N, D), dtype=jnp.float32)

    # Deterministic "PyTorch-like" Linear init: U(-1/sqrt(fan_in), 1/sqrt(fan_in)).
    w_qkv = jax.random.uniform(kq, (3 * inner, D), jnp.float32,
                               -1.0 / D ** 0.5, 1.0 / D ** 0.5)
    w_out = jax.random.uniform(kw, (D, inner), jnp.float32,
                               -1.0 / inner ** 0.5, 1.0 / inner ** 0.5)
    b_out = jax.random.uniform(kb, (D,), jnp.float32,
                               -1.0 / inner ** 0.5, 1.0 / inner ** 0.5)
    gamma = jnp.ones((D,), jnp.float32) + 0.1 * jax.random.normal(kg, (D,), jnp.float32)
    beta = 0.1 * jax.random.normal(kbt, (D,), jnp.float32)

    params, project_out = prepare_params(w_qkv, w_out, b_out, gamma, beta,
                                         heads=heads, dim_head=dim_head)

    y = prenorm_attention_forward(x, params, heads=heads, dim_head=dim_head,
                                  project_out=project_out, tq=tq, tk=tk)
    y = jax.block_until_ready(y)

    y_ref = reference_forward(x, gamma, beta, w_qkv, w_out, b_out,
                              heads=heads, dim_head=dim_head)
    assert y.shape == y_ref.shape
    max_err = float(jnp.max(jnp.abs(y - y_ref)))
    assert jnp.allclose(y, y_ref, atol=2e-3, rtol=2e-3), \
        f"mismatch vs reference (max abs err {max_err:.2e})"

    print("KERNEL_OK")
</pallas_src>

<mosaic_0001>
module attributes {stable_mosaic.version = 11 : i64} {
  func.func @_prenorm_attn_kernel(%arg0: i32, %arg1: i32, %arg2: i32, %arg3: memref<1x8x32xf32, #tpu.memory_space<vmem>>, %arg4: memref<1x8x32xf32, #tpu.memory_space<vmem>>, %arg5: memref<1x32xf32, #tpu.memory_space<vmem>>, %arg6: memref<1x32xf32, #tpu.memory_space<vmem>>, %arg7: memref<32x64xf32, #tpu.memory_space<vmem>>, %arg8: memref<32x128xf32, #tpu.memory_space<vmem>>, %arg9: memref<64x32xf32, #tpu.memory_space<vmem>>, %arg10: memref<1x32xf32, #tpu.memory_space<vmem>>, %arg11: memref<1x8x32xf32, #tpu.memory_space<vmem>>, %arg12: memref<2x8x32xf32, #tpu.memory_space<vmem>>, %arg13: memref<2x8x1xf32, #tpu.memory_space<vmem>>, %arg14: memref<2x8x1xf32, #tpu.memory_space<vmem>>, %arg15: memref<2x8x32xf32, #tpu.memory_space<vmem>>) attributes {dimension_semantics = [#tpu.dimension_semantics<parallel>, #tpu.dimension_semantics<parallel>, #tpu.dimension_semantics<arbitrary>], iteration_bounds = array<i64: 2, 2, 2>, scalar_prefetch = 0 : i64, scratch_operands = 4 : i64, tpu.core_type = #tpu.core_type<tc>, window_params = [{transform_indices = @transform_0, window_bounds = array<i64: 1, 8, 32>}, {transform_indices = @transform_1, window_bounds = array<i64: 1, 8, 32>}, {pipeline_mode = #tpu.pipeline_mode<synchronous>, transform_indices = @transform_2, window_bounds = array<i64: 1, 32>}, {pipeline_mode = #tpu.pipeline_mode<synchronous>, transform_indices = @transform_3, window_bounds = array<i64: 1, 32>}, {pipeline_mode = #tpu.pipeline_mode<synchronous>, transform_indices = @transform_4, window_bounds = array<i64: 32, 64>}, {pipeline_mode = #tpu.pipeline_mode<synchronous>, transform_indices = @transform_5, window_bounds = array<i64: 32, 128>}, {pipeline_mode = #tpu.pipeline_mode<synchronous>, transform_indices = @transform_6, window_bounds = array<i64: 64, 32>}, {pipeline_mode = #tpu.pipeline_mode<synchronous>, transform_indices = @transform_7, window_bounds = array<i64: 1, 32>}, {transform_indices = @transform_8, window_bounds = array<i64: 1, 8, 32>}]} {
    %c0 = arith.constant 0 : index
    %c0_0 = arith.constant 0 : index
    %0 = vector.load %arg5[%c0, %c0_0] : memref<1x32xf32, #tpu.memory_space<vmem>>, vector<1x32xf32>
    %c0_1 = arith.constant 0 : index
    %c0_2 = arith.constant 0 : index
    %1 = vector.load %arg6[%c0_1, %c0_2] : memref<1x32xf32, #tpu.memory_space<vmem>>, vector<1x32xf32>
    %c0_i32 = arith.constant 0 : i32
    %2 = arith.cmpi eq, %arg2, %c0_i32 : i32
    %3 = arith.extui %2 : i1 to i32
    %c0_i32_3 = arith.constant 0 : i32
    %4 = arith.cmpi ne, %3, %c0_i32_3 : i32
    scf.if %4 {
      %c0_40 = arith.constant 0 : index
      %c0_41 = arith.constant 0 : index
      %c0_42 = arith.constant 0 : index
      %62 = vector.load %arg3[%c0_40, %c0_41, %c0_42] : memref<1x8x32xf32, #tpu.memory_space<vmem>>, vector<1x8x32xf32>
      %63 = vector.shape_cast %62 : vector<1x8x32xf32> to vector<8x32xf32>
      %cst_43 = arith.constant dense<0.000000e+00> : vector<8xf32>
      %64 = vector.multi_reduction <add>, %63, %cst_43 [1] : vector<8x32xf32> to vector<8xf32>
      %65 = vector.shape_cast %64 : vector<8xf32> to vector<8x1xf32>
      %cst_44 = arith.constant 3.200000e+01 : f32
      %66 = vector.broadcast %cst_44 : f32 to vector<8x1xf32>
      %67 = arith.divf %65, %66 : vector<8x1xf32>
      %68 = vector.broadcast %67 : vector<8x1xf32> to vector<8x32xf32>
      %69 = arith.subf %63, %68 : vector<8x32xf32>
      %70 = arith.mulf %69, %69 : vector<8x32xf32>
      %cst_45 = arith.constant dense<0.000000e+00> : vector<8xf32>
      %71 = vector.multi_reduction <add>, %70, %cst_45 [1] : vector<8x32xf32> to vector<8xf32>
      %72 = vector.shape_cast %71 : vector<8xf32> to vector<8x1xf32>
      %cst_46 = arith.constant 3.200000e+01 : f32
      %73 = vector.broadcast %cst_46 : f32 to vector<8x1xf32>
      %74 = arith.divf %72, %73 : vector<8x1xf32>
      %cst_47 = arith.constant 9.99999974E-6 : f32
      %75 = vector.broadcast %cst_47 : f32 to vector<8x1xf32>
      %76 = arith.addf %74, %75 : vector<8x1xf32>
      %77 = math.rsqrt %76 : vector<8x1xf32>
      %78 = vector.broadcast %77 : vector<8x1xf32> to vector<8x32xf32>
      %79 = arith.mulf %69, %78 : vector<8x32xf32>
      %80 = vector.broadcast %0 : vector<1x32xf32> to vector<8x32xf32>
      %81 = arith.mulf %79, %80 : vector<8x32xf32>
      %82 = vector.broadcast %1 : vector<1x32xf32> to vector<8x32xf32>
      %83 = arith.addf %81, %82 : vector<8x32xf32>
      %c0_48 = arith.constant 0 : index
      %c0_49 = arith.constant 0 : index
      %84 = vector.load %arg7[%c0_48, %c0_49] : memref<32x64xf32, #tpu.memory_space<vmem>>, vector<32x64xf32>
      %cst_50 = arith.constant dense<0.000000e+00> : vector<8x64xf32>
      %85 = tpu.matmul %83, %84, %cst_50 {dimension_numbers = #tpu.dot_dimension_numbers<[1], [0], [0], [1], [0, 0, 1, 1], [], []>} : vector<8x32xf32>, vector<32x64xf32>, vector<8x64xf32> -> vector<8x64xf32>
      %86 = vector.shape_cast %85 : vector<8x64xf32> to vector<8x2x32xf32>
      %87 = tpu.transpose %86, [1, 0, 2] : vector<8x2x32xf32> -> vector<2x8x32xf32>
      %c0_51 = arith.constant 0 : index
      %c0_52 = arith.constant 0 : index
      %c0_53 = arith.constant 0 : index
      %88 = vector.load %arg12[%c0_51, %c0_52, %c0_53] : memref<2x8x32xf32, #tpu.memory_space<vmem>>, vector<2x8x32xf32>
      tpu.vector_store %arg12[%c0_51, %c0_52, %c0_53], %87 {strides = array<i32>} : memref<2x8x32xf32, #tpu.memory_space<vmem>>, vector<2x8x32xf32>,
      %cst_54 = arith.constant 0xFF800000 : f32
      %89 = vector.broadcast %cst_54 : f32 to vector<2x8x1xf32>
      %c0_55 = arith.constant 0 : index
      %c0_56 = arith.constant 0 : index
      %c0_57 = arith.constant 0 : index
      %90 = vector.load %arg13[%c0_55, %c0_56, %c0_57] : memref<2x8x1xf32, #tpu.memory_space<vmem>>, vector<2x8x1xf32>
      tpu.vector_store %arg13[%c0_55, %c0_56, %c0_57], %89 {strides = array<i32>} : memref<2x8x1xf32, #tpu.memory_space<vmem>>, vector<2x8x1xf32>,
      %cst_58 = arith.constant 0.000000e+00 : f32
      %91 = vector.broadcast %cst_58 : f32 to vector<2x8x1xf32>
      %c0_59 = arith.constant 0 : index
      %c0_60 = arith.constant 0 : index
      %c0_61 = arith.constant 0 : index
      %92 = vector.load %arg14[%c0_59, %c0_60, %c0_61] : memref<2x8x1xf32, #tpu.memory_space<vmem>>, vector<2x8x1xf32>
      tpu.vector_store %arg14[%c0_59, %c0_60, %c0_61], %91 {strides = array<i32>} : memref<2x8x1xf32, #tpu.memory_space<vmem>>, vector<2x8x1xf32>,
      %cst_62 = arith.constant 0.000000e+00 : f32
      %93 = vector.broadcast %cst_62 : f32 to vector<2x8x32xf32>
      %c0_63 = arith.constant 0 : index
      %c0_64 = arith.constant 0 : index
      %c0_65 = arith.constant 0 : index
      %94 = vector.load %arg15[%c0_63, %c0_64, %c0_65] : memref<2x8x32xf32, #tpu.memory_space<vmem>>, vector<2x8x32xf32>
      tpu.vector_store %arg15[%c0_63, %c0_64, %c0_65], %93 {strides = array<i32>} : memref<2x8x32xf32, #tpu.memory_space<vmem>>, vector<2x8x32xf32>,
    } else {
    }
    %c0_4 = arith.constant 0 : index
    %c0_5 = arith.constant 0 : index
    %c0_6 = arith.constant 0 : index
    %5 = vector.load %arg4[%c0_4, %c0_5, %c0_6] : memref<1x8x32xf32, #tpu.memory_space<vmem>>, vector<1x8x32xf32>
    %6 = vector.shape_cast %5 : vector<1x8x32xf32> to vector<8x32xf32>
    %cst = arith.constant dense<0.000000e+00> : vector<8xf32>
    %7 = vector.multi_reduction <add>, %6, %cst [1] : vector<8x32xf32> to vector<8xf32>
    %8 = vector.shape_cast %7 : vector<8xf32> to vector<8x1xf32>
    %cst_7 = arith.constant 3.200000e+01 : f32
    %9 = vector.broadcast %cst_7 : f32 to vector<8x1xf32>
    %10 = arith.divf %8, %9 : vector<8x1xf32>
    %11 = vector.broadcast %10 : vector<8x1xf32> to vector<8x32xf32>
    %12 = arith.subf %6, %11 : vector<8x32xf32>
    %13 = arith.mulf %12, %12 : vector<8x32xf32>
    %cst_8 = arith.constant dense<0.000000e+00> : vector<8xf32>
    %14 = vector.multi_reduction <add>, %13, %cst_8 [1] : vector<8x32xf32> to vector<8xf32>
    %15 = vector.shape_cast %14 : vector<8xf32> to vector<8x1xf32>
    %cst_9 = arith.constant 3.200000e+01 : f32
    %16 = vector.broadcast %cst_9 : f32 to vector<8x1xf32>
    %17 = arith.divf %15, %16 : vector<8x1xf32>
    %cst_10 = arith.constant 9.99999974E-6 : f32
    %18 = vector.broadcast %cst_10 : f32 to vector<8x1xf32>
    %19 = arith.addf %17, %18 : vector<8x1xf32>
    %20 = math.rsqrt %19 : vector<8x1xf32>
    %21 = vector.broadcast %20 : vector<8x1xf32> to vector<8x32xf32>
    %22 = arith.mulf %12, %21 : vector<8x32xf32>
    %23 = vector.broadcast %0 : vector<1x32xf32> to vector<8x32xf32>
    %24 = arith.mulf %22, %23 : vector<8x32xf32>
    %25 = vector.broadcast %1 : vector<1x32xf32> to vector<8x32xf32>
    %26 = arith.addf %24, %25 : vector<8x32xf32>
    %c0_11 = arith.constant 0 : index
    %c0_12 = arith.constant 0 : index
    %27 = vector.load %arg8[%c0_11, %c0_12] : memref<32x128xf32, #tpu.memory_space<vmem>>, vector<32x128xf32>
    %cst_13 = arith.constant dense<0.000000e+00> : vector<8x128xf32>
    %28 = tpu.matmul %26, %27, %cst_13 {dimension_numbers = #tpu.dot_dimension_numbers<[1], [0], [0], [1], [0, 0, 1, 1], [], []>} : vector<8x32xf32>, vector<32x128xf32>, vector<8x128xf32> -> vector<8x128xf32>
    %29 = vector.extract_strided_slice %28 {offsets = [0, 0], sizes = [8, 64], strides = [1, 1]} : vector<8x128xf32> to vector<8x64xf32>
    %30 = vector.shape_cast %29 : vector<8x64xf32> to vector<8x2x32xf32>
    %31 = tpu.transpose %30, [1, 0, 2] : vector<8x2x32xf32> -> vector<2x8x32xf32>
    %32 = vector.extract_strided_slice %28 {offsets = [0, 64], sizes = [8, 64], strides = [1, 1]} : vector<8x128xf32> to vector<8x64xf32>
    %33 = vector.shape_cast %32 : vector<8x64xf32> to vector<8x2x32xf32>
    %34 = tpu.transpose %33, [1, 0, 2] : vector<8x2x32xf32> -> vector<2x8x32xf32>
    %c0_14 = arith.constant 0 : index
    %c0_15 = arith.constant 0 : index
    %c0_16 = arith.constant 0 : index
    %35 = vector.load %arg12[%c0_14, %c0_15, %c0_16] : memref<2x8x32xf32, #tpu.memory_space<vmem>>, vector<2x8x32xf32>
    "tpu.trace_start"() <{level = 10 : i32, message = "hnd,hmd->hnm"}> : () -> ()
    %cst_17 = arith.constant dense<0.000000e+00> : vector<2x8x8xf32>
    %36 = tpu.matmul %35, %31, %cst_17 {dimension_numbers = #tpu.dot_dimension_numbers<[2], [2], [1], [1], [0, 0, 0, 1, 1, 1], [0], [0]>} : vector<2x8x32xf32>, vector<2x8x32xf32>, vector<2x8x8xf32> -> vector<2x8x8xf32>
    "tpu.trace_stop"() : () -> ()
    %c0_18 = arith.constant 0 : index
    %c0_19 = arith.constant 0 : index
    %c0_20 = arith.constant 0 : index
    %37 = vector.load %arg13[%c0_18, %c0_19, %c0_20] : memref<2x8x1xf32, #tpu.memory_space<vmem>>, vector<2x8x1xf32>
    %cst_21 = arith.constant dense<0xFF800000> : vector<2x8xf32>
    %38 = vector.multi_reduction <maximumf>, %36, %cst_21 [2] : vector<2x8x8xf32> to vector<2x8xf32>
    %39 = vector.shape_cast %38 : vector<2x8xf32> to vector<2x8x1xf32>
    %40 = arith.maximumf %37, %39 : vector<2x8x1xf32>
    %41 = arith.subf %37, %40 : vector<2x8x1xf32>
    %42 = math.exp %41 : vector<2x8x1xf32>
    %43 = vector.broadcast %40 : vector<2x8x1xf32> to vector<2x8x8xf32>
    %44 = arith.subf %36, %43 : vector<2x8x8xf32>
    %45 = math.exp %44 : vector<2x8x8xf32>
    %c0_22 = arith.constant 0 : index
    %c0_23 = arith.constant 0 : index
    %c0_24 = arith.constant 0 : index
    %46 = vector.load %arg14[%c0_22, %c0_23, %c0_24] : memref<2x8x1xf32, #tpu.memory_space<vmem>>, vector<2x8x1xf32>
    %47 = arith.mulf %42, %46 : vector<2x8x1xf32>
    %cst_25 = arith.constant dense<0.000000e+00> : vector<2x8xf32>
    %48 = vector.multi_reduction <add>, %45, %cst_25 [2] : vector<2x8x8xf32> to vector<2x8xf32>
    %49 = vector.shape_cast %48 : vector<2x8xf32> to vector<2x8x1xf32>
    %50 = arith.addf %47, %49 : vector<2x8x1xf32>
    %c0_26 = arith.constant 0 : index
    %c0_27 = arith.constant 0 : index
    %c0_28 = arith.constant 0 : index
    %51 = vector.load %arg14[%c0_26, %c0_27, %c0_28] : memref<2x8x1xf32, #tpu.memory_space<vmem>>, vector<2x8x1xf32>
    tpu.vector_store %arg14[%c0_26, %c0_27, %c0_28], %50 {strides = array<i32>} : memref<2x8x1xf32, #tpu.memory_space<vmem>>, vector<2x8x1xf32>,
    %c0_29 = arith.constant 0 : index
    %c0_30 = arith.constant 0 : index
    %c0_31 = arith.constant 0 : index
    %52 = vector.load %arg15[%c0_29, %c0_30, %c0_31] : memref<2x8x32xf32, #tpu.memory_space<vmem>>, vector<2x8x32xf32>
    %53 = vector.broadcast %42 : vector<2x8x1xf32> to vector<2x8x32xf32>
    %54 = arith.mulf %53, %52 : vector<2x8x32xf32>
    "tpu.trace_start"() <{level = 10 : i32, message = "hnm,hmd->hnd"}> : () -> ()
    %cst_32 = arith.constant dense<0.000000e+00> : vector<2x8x32xf32>
    %55 = tpu.matmul %45, %34, %cst_32 {dimension_numbers = #tpu.dot_dimension_numbers<[2], [1], [1], [2], [0, 0, 0, 1, 1, 2], [0], [0]>} : vector<2x8x8xf32>, vector<2x8x32xf32>, vector<2x8x32xf32> -> vector<2x8x32xf32>
    "tpu.trace_stop"() : () -> ()
    %56 = arith.addf %54, %55 : vector<2x8x32xf32>
    %c0_33 = arith.constant 0 : index
    %c0_34 = arith.constant 0 : index
    %c0_35 = arith.constant 0 : index
    %57 = vector.load %arg15[%c0_33, %c0_34, %c0_35] : memref<2x8x32xf32, #tpu.memory_space<vmem>>, vector<2x8x32xf32>
    tpu.vector_store %arg15[%c0_33, %c0_34, %c0_35], %56 {strides = array<i32>} : memref<2x8x32xf32, #tpu.memory_space<vmem>>, vector<2x8x32xf32>,
    %c0_36 = arith.constant 0 : index
    %c0_37 = arith.constant 0 : index
    %c0_38 = arith.constant 0 : index
    %58 = vector.load %arg13[%c0_36, %c0_37, %c0_38] : memref<2x8x1xf32, #tpu.memory_space<vmem>>, vector<2x8x1xf32>
    tpu.vector_store %arg13[%c0_36, %c0_37, %c0_38], %40 {strides = array<i32>} : memref<2x8x1xf32, #tpu.memory_space<vmem>>, vector<2x8x1xf32>,
    %c1_i32 = arith.constant 1 : i32
    %59 = arith.cmpi eq, %arg2, %c1_i32 : i32
    %60 = arith.extui %59 : i1 to i32
    %c0_i32_39 = arith.constant 0 : i32
    %61 = arith.cmpi ne, %60, %c0_i32_39 : i32
    scf.if %61 {
      %c0_40 = arith.constant 0 : index
      %c0_41 = arith.constant 0 : index
      %c0_42 = arith.constant 0 : index
      %62 = vector.load %arg15[%c0_40, %c0_41, %c0_42] : memref<2x8x32xf32, #tpu.memory_space<vmem>>, vector<2x8x32xf32>
      %c0_43 = arith.constant 0 : index
      %c0_44 = arith.constant 0 : index
      %c0_45 = arith.constant 0 : index
      %63 = vector.load %arg14[%c0_43, %c0_44, %c0_45] : memref<2x8x1xf32, #tpu.memory_space<vmem>>, vector<2x8x1xf32>
      %64 = vector.broadcast %63 : vector<2x8x1xf32> to vector<2x8x32xf32>
      %65 = arith.divf %62, %64 : vector<2x8x32xf32>
      %66 = tpu.transpose %65, [1, 0, 2] : vector<2x8x32xf32> -> vector<8x2x32xf32>
      %67 = vector.shape_cast %66 : vector<8x2x32xf32> to vector<8x64xf32>
      %c0_46 = arith.constant 0 : index
      %c0_47 = arith.constant 0 : index
      %68 = vector.load %arg9[%c0_46, %c0_47] : memref<64x32xf32, #tpu.memory_space<vmem>>, vector<64x32xf32>
      %cst_48 = arith.constant dense<0.000000e+00> : vector<8x32xf32>
      %69 = tpu.matmul %67, %68, %cst_48 {dimension_numbers = #tpu.dot_dimension_numbers<[1], [0], [0], [1], [0, 0, 1, 1], [], []>} : vector<8x64xf32>, vector<64x32xf32>, vector<8x32xf32> -> vector<8x32xf32>
      %c0_49 = arith.constant 0 : index
      %c0_50 = arith.constant 0 : index
      %70 = vector.load %arg10[%c0_49, %c0_50] : memref<1x32xf32, #tpu.memory_space<vmem>>, vector<1x32xf32>
      %71 = vector.broadcast %70 : vector<1x32xf32> to vector<8x32xf32>
      %72 = arith.addf %69, %71 : vector<8x32xf32>
      %c0_51 = arith.constant 0 : index
      %c0_52 = arith.constant 0 : index
      %c0_53 = arith.constant 0 : index
      %73 = vector.load %arg11[%c0_51, %c0_52, %c0_53] : memref<1x8x32xf32, #tpu.memory_space<vmem>>, vector<1x8x32xf32>
      %74 = vector.shape_cast %73 : vector<1x8x32xf32> to vector<8x32xf32>
      %75 = vector.shape_cast %72 : vector<8x32xf32> to vector<1x8x32xf32>
      tpu.vector_store %arg11[%c0_51, %c0_52, %c0_53], %75 {strides = array<i32>} : memref<1x8x32xf32, #tpu.memory_space<vmem>>, vector<1x8x32xf32>,
    } else {
    }
    return
  }
  func.func @transform_0(%arg0: i32, %arg1: i32, %arg2: i32) -> (i32, i32, i32) {
    %c0_i32 = arith.constant 0 : i32
    %c0_i32_0 = arith.constant 0 : i32
    return %arg0, %arg1, %c0_i32 : i32, i32, i32
  }
  func.func @transform_1(%arg0: i32, %arg1: i32, %arg2: i32) -> (i32, i32, i32) {
    %c0_i32 = arith.constant 0 : i32
    %c0_i32_0 = arith.constant 0 : i32
    return %arg0, %arg2, %c0_i32 : i32, i32, i32
  }
  func.func @transform_2(%arg0: i32, %arg1: i32, %arg2: i32) -> (i32, i32) {
    %c0_i32 = arith.constant 0 : i32
    %c0_i32_0 = arith.constant 0 : i32
    %c0_i32_1 = arith.constant 0 : i32
    return %c0_i32, %c0_i32_0 : i32, i32
  }
  func.func @transform_3(%arg0: i32, %arg1: i32, %arg2: i32) -> (i32, i32) {
    %c0_i32 = arith.constant 0 : i32
    %c0_i32_0 = arith.constant 0 : i32
    %c0_i32_1 = arith.constant 0 : i32
    return %c0_i32, %c0_i32_0 : i32, i32
  }
  func.func @transform_4(%arg0: i32, %arg1: i32, %arg2: i32) -> (i32, i32) {
    %c0_i32 = arith.constant 0 : i32
    %c0_i32_0 = arith.constant 0 : i32
    %c0_i32_1 = arith.constant 0 : i32
    return %c0_i32, %c0_i32_0 : i32, i32
  }
  func.func @transform_5(%arg0: i32, %arg1: i32, %arg2: i32) -> (i32, i32) {
    %c0_i32 = arith.constant 0 : i32
    %c0_i32_0 = arith.constant 0 : i32
    %c0_i32_1 = arith.constant 0 : i32
    return %c0_i32, %c0_i32_0 : i32, i32
  }
  func.func @transform_6(%arg0: i32, %arg1: i32, %arg2: i32) -> (i32, i32) {
    %c0_i32 = arith.constant 0 : i32
    %c0_i32_0 = arith.constant 0 : i32
    %c0_i32_1 = arith.constant 0 : i32
    return %c0_i32, %c0_i32_0 : i32, i32
  }
  func.func @transform_7(%arg0: i32, %arg1: i32, %arg2: i32) -> (i32, i32) {
    %c0_i32 = arith.constant 0 : i32
    %c0_i32_0 = arith.constant 0 : i32
    %c0_i32_1 = arith.constant 0 : i32
    return %c0_i32, %c0_i32_0 : i32, i32
  }
  func.func @transform_8(%arg0: i32, %arg1: i32, %arg2: i32) -> (i32, i32, i32) {
    %c0_i32 = arith.constant 0 : i32
    %c0_i32_0 = arith.constant 0 : i32
    return %arg0, %arg1, %c0_i32 : i32, i32, i32
  }
}

</mosaic_0001>

<bundles_post_ra>
// kernel: prenorm_attention_forward.1
= control target key start
LH: loop header
LB: loop body
LE: loop exit
PB: predicated region body
PF: predicated region fallthrough
CT: control target
= control target key end

     0   :  { %s2467_s0 = inlined_call_operand.vmem [shape: f32[2,16,32], index: 0, kind: input, shape index: {}, may-alias: {0,1}]   ;;  %s2468_s1 = inlined_call_operand.vmem [shape: f32[2,16,32], index: 1, kind: input, shape index: {}, may-alias: {0,1}]   ;;  %s2469_s2 = inlined_call_operand.vmem [shape: f32[1,32], index: 2, kind: input, shape index: {}]   ;;  %s2470_s3 = inlined_call_operand.vmem [shape: f32[1,32], index: 3, kind: input, shape index: {}]   ;;  %s2471_s4 = inlined_call_operand.vmem [shape: f32[32,64], index: 4, kind: input, shape index: {}]   ;;  %s2472_s5 = inlined_call_operand.vmem [shape: f32[32,128], index: 5, kind: input, shape index: {}]   ;;  %s2473_s6 = inlined_call_operand.vmem [shape: f32[64,32], index: 6, kind: input, shape index: {}]   ;;  %s2474_s7 = inlined_call_operand.vmem [shape: f32[1,32], index: 7, kind: input, shape index: {}]   ;;  %s2475_s8 = inlined_call_operand.hbm [shape: f32[2,16,32], index: 8, kind: output, shape index: {}]  }
   0x1   :  { %2483 = sst [smem:[#allocation17_spill]] %s2469_s2 }
   0x2   :  { %2484 = sst [smem:[#allocation18_spill]] %s2470_s3 }
   0x3   :  { %13 = vsyncpa [#allocation7], 0 }
   0x4   :  { %15 = vsyncpa [#allocation7 + $0x1], 0  ;;  %s2128_s27 = smov 0   ;;  %s2130_s28 = smov 0  }
   0x5   :  { %s2132_s29 = smov 0   ;;  %s2134_s30 = smov 0  }
   0x6   :  { %s2136_s9 = smov 0   ;;  %s2138_s10 = smov 0  }
   0x7   :  { %s2140_s11 = smov 0   ;;  %s2142_s12 = smov 0  }
   0x8   :  { %s2144_s13 = smov 0   ;;  %s2146_s14 = smov 0  }
   0x9 LB: > { %2485 = sst [smem:[#allocation9_spill]] %s2032_s29  ;;  %s1677_s15 = sadd.s32 4294967295, %s2060_s14   ;;  %s2060_s14 = sphi %s2146_s14, %s21_s14   ;;  %s2056_s13 = sphi %s2144_s13, %s2505_s13   ;;  %s2052_s12 = sphi %s2142_s12, %s2504_s12   ;;  %s2048_s11 = sphi %s2140_s11, %s2503_s11   ;;  %s2044_s10 = sphi %s2138_s10, %s2502_s10   ;;  %s2040_s9 = sphi %s2136_s9, %s2501_s9   ;;  %s2036_s30 = sphi %s2134_s30, %s2500_s30   ;;  %s2032_s29 = sphi %s2132_s29, %s2499_s29   ;;  %s2028_s28 = sphi %s2130_s28, %s2507_s28   ;;  %s2024_s27 = sphi %s2128_s27, %s2506_s27  }
   0xa   : > { %2486 = sst [smem:[#allocation10_spill]] %s2048_s11  ;;  %s1678_s16 = sadd.s32 4294967294, %s2060_s14  }
   0xb   : > { %2487 = sst [smem:[#allocation11_spill]] %s2052_s12  ;;  %s33_s17 = sadd.s32 1, %s2048_s11 }
   0xc   : > { %2488 = sst [smem:[#allocation12_spill]] %s2056_s13  ;;  %p34_p0 = scmp.ge.s32.totalorder %s33_s17, 2 }
   0xd   : > { %s36_s18 = sadd.s32 1, %s2052_s12  ;;  %s40_s19 = sadd.s32 1, %s2056_s13 }
   0xe   : > { %p241_p1 = scmp.ne.s32.totalorder %s2032_s29, %s2028_s28  ;;  %s2509_s17 = smov (%p34_p0, %s33_s17), 0 }
   0xf   : > { %2489 = sst [smem:[#allocation13_spill]] %s2509_s17  ;;  %s2511_s18 = smov (!%p34_p0, %s36_s18), %s2052_s12 }
  0x10   : > { %p242_p2 = scmp.eq.s32.totalorder %s1677_s15, 7  ;;  %p247_p3 = scmp.ne.s32.totalorder %s2028_s28, %s2024_s27 }
  0x11   : > { %p38_p4 = scmp.ge.s32.totalorder %s2511_s18, 2  ;;  %p248_p5 = scmp.eq.s32.totalorder %s1678_s16, 7 }
  0x12   : > { %p2190_p6 = por %p242_p2, %p241_p1  ;;  %p1681_p8 = scmp.ge.s32.totalorder %s2060_s14, 1 }
  0x13   : > { %s2513_s18 = smov (%p38_p4, %s2511_s18), 0  ;;  %s2515_s19 = smov (!%p38_p4, %s40_s19), %s2056_s13 }
  0x14   : > { %2491 = sst [smem:[#allocation14_spill]] %s2513_s18  ;;  %p2197_p7 = por %p248_p5, %p247_p3 }
  0x15   : > { %p42_p9 = scmp.ge.s32.totalorder %s2515_s19, 2  ;;  %p306_p10 = scmp.lt.s32.totalorder %s2060_s14, 9 }
  0x16   : > { %s227_s22 = ssub.s32 %s2052_s12, %s2513_s18  ;;  %s231_s25 = sadd.s32 1, %s2032_s29 }
  0x17   : > { %s2517_s19 = smov (%p42_p9, %s2515_s19), 0  ;;  %p307_p11 = pnand %p1681_p8, %p306_p10 }
  0x18   : > { %2493 = sst [smem:[#allocation15_spill]] %s2517_s19  ;;  %s226_s23 = ssub.s32 %s2056_s13, %s2517_s19 }
  0x19   : > { %s228_s24 = sor.u32 %s227_s22, %s226_s23  ;;  %310 = sbr.rel (%p307_p11) target bundleno = 2534 (0x9e6), region = 52 }
  0x1a   : > { %p229_p12 = scmp.eq.s32.totalorder %s228_s24, 0  ;;  %s2481_s15 = sand.u32 (!%p307_p11), 1, %s2028_s28  }
  0x1b   : > { %p351_p13 = scmp.lt.s32.totalorder (!%p307_p11), %s2044_s10, 1  ;;  %s2495_s2 = sld [smem:[#allocation17_spill]] (!%p307_p11) }
  0x1c   : > { %s2211_s26 = scalar_select %p229_p12, %s2032_s29, %s231_s25  }
  0x1d   : > { %s2496_s3 = sld [smem:[#allocation18_spill]] (!%p307_p11)  ;;  %s2227_s24 = sshll.u32 (!%p307_p11), %s2481_s15, 3 }
  0x1e   : > { %2494 = sst [smem:[#allocation16_spill]] %s2211_s26  ;;  %p353_p0 = scmp.lt.s32.totalorder (!%p307_p11), %s2040_s9, 1 }
  0x1f   : > { %p361_p1 = scmp.lt.s32.totalorder (!%p307_p11), %s2036_s30, 1  ;;  %s350_s29 = scalar_lea.vmem (!%p307_p11), [#allocation6], %s2227_s24 }
  0x20   : > { %s352_s25 = scalar_select %p351_p13, %s2044_s10, 1 }
  0x21   : > { %v2218_v0 = vld [vmem:[%s2495_s2] sm:$0x1]  ;;  %s354_s19 = scalar_select %p353_p0, %s2040_s9, 1 }
  0x22   : > { %s1683_s17 = sshll.u32 %s352_s25, 1  ;;  %p1687_p2 = scmp.ne.s32.totalorder %s2036_s30, 0 }
  0x23   : > { %v2223_v1 = vld [vmem:[%s2496_s3] sm:$0x1]  ;;  %s356_s13 = sadd.s32 %s1683_s17, %s354_s19  ;;  %vm374_vm0 = vcmask (!%p1687_p2), 261120   ;;  %v404_v10 = vld [vmem:[%s2471_s4 + $0x8] sm:$0xff] (!%p1687_p2)  ;;  %v405_v11 = vld [vmem:[%s2471_s4 + $0x10] sm:$0xff] (!%p1687_p2)  ;;  %v2062_v12 = vmov (!%p1687_p2), 0.0|0.0   ;;  %v390_v20 = vlaneseq (!%p1687_p2) }
  0x24   : > { %s1684_s12 = sshll.u32 %s356_s13, 3  ;;  %372 = sbr.rel (%p1687_p2) target bundleno = 699 (0x2bb), region = 56  ;;  %v403_v9 = vld [vmem:[%s2471_s4] sm:$0xff] (!%p1687_p2)  ;;  %1800 = vmatprep.subr.bf16.mxu0 (!%p1687_p2), %v2062_v12  ;;  %v406_v14 = vld [vmem:[%s2471_s4 + $0x18] sm:$0xff] (!%p1687_p2)  ;;  %vm2063_vm1 = vmmov (!%p1687_p2), 0   ;;  %v2064_v15 = vmov (!%p1687_p2), 0.0  }
  0x25   : > { %s358_s16 = scalar_lea.vmem %s2467_s0, %s1684_s12  ;;  %v1801_v13 = vpack.c.bf16 (!%p1687_p2), %v404_v10, %v403_v9  ;;  %1747 = vmatprep.mubr.msk.f32.mxu0 (!%p1687_p2), %vm2063_vm1, %v2064_v15  ;;  %vm602_vm2 = vcmask (!%p1687_p2), 7168   ;;  %607 = vst.msk [vmem:[#allocation5] sm:$0xff] (!%p1687_p2), %vm374_vm0, %v2064_v15  ;;  %608 = vst.msk [vmem:[#allocation5 + $0x8] sm:$0xff] (!%p1687_p2), %vm374_vm0, %v2064_v15  ;;  %v2065_v16 = vmov (!%p1687_p2), -inf   ;;  %v1804_v17 = vpack.c.bf16 (!%p1687_p2), %v406_v14, %v405_v11  ;;  %s2067_s25 = smov (!%p1687_p2), 96  }
  0x26   : > { %s362_s2 = scalar_select %p361_p1, %s2036_s30, 1 }
  0x27   : > { %v373_v2 = vld [vmem:[%s358_s16] sm:$0xff] (!%p1687_p2)  ;;  %603 = vst.msk [vmem:[#allocation3] sm:$0xff] (!%p1687_p2), %vm602_vm2, %v2065_v16  ;;  %604 = vst.msk [vmem:[#allocation3 + $0x8] sm:$0xff] (!%p1687_p2), %vm602_vm2, %v2065_v16  ;;  %1802 = vmatpush3.bf16.msra.mxu0 (!%p1687_p2), %v1801_v13  ;;  %v391_v22 = vshrl.u32 (!%p1687_p2), %v390_v20, 7  ;;  %v2066_v30 = vmov (!%p1687_p2), 1983009808  }
  0x28   : > { %s364_s26 = sadd.s32 %s1683_s17, %s362_s2  ;;  %v375_v3 = vsel (!%p1687_p2), %vm374_vm0, %v373_v2, 0.0  ;;  %605 = vst.msk [vmem:[#allocation4] sm:$0xff] (!%p1687_p2), %vm602_vm2, %v2064_v15  ;;  %606 = vst.msk [vmem:[#allocation4 + $0x8] sm:$0xff] (!%p1687_p2), %vm602_vm2, %v2064_v15  ;;  %1803 = vmatprep.subr.bf16.mxu0 (!%p1687_p2), %v2062_v12  ;;  %v486_v31 = vunpack.c.l.s4 (!%p1687_p2), %v2066_v30  ;;  %v2068_v39 = vmov (!%p1687_p2), 1934713408  }
  0x29   : > { %s1686_s22 = sshll.u32 %s364_s26, 3  ;;  %376 = vadd.xlane.f32.xlu0 (!%p1687_p2), %v375_v3  ;;  %v392_v23 = vsub.s32 (!%p1687_p2), 0, %v391_v22  ;;  %v517_v40 = vunpack.c.l.s4 (!%p1687_p2), %v2068_v39 }
  0x2a   : > { %s2240_s15 = scalar_lea.vmem %s2468_s1, %s1686_s22  ;;  %v487_v32 = vunpack.c.0.s8 (!%p1687_p2), %v486_v31 }
  0x2b   : > { %1805 = vmatpush3.bf16.msra.mxu0 %v1804_v17  ;;  %v393_v24 = vrot.slane %v2218_v0, %v392_v23  ;;  %v400_v27 = vrot.slane %v2223_v1, %v392_v23  ;;  %v518_v41 = vunpack.c.0.s8 %v517_v40 }
  0x2c   : > { %v490_v33 = vsub.s32 %v487_v32, %v391_v22 }
  0x2d   : > { %v521_v43 = vsub.s32 %v518_v41, %v391_v22 }
  0xb6   : > { %v377_v4 = vpop.xlane.xlu0 %376 }
  0xb7   : > { %v379_v5 = vmul.f32 0.03125, %v377_v4 }
  0xb9   : > { %v380_v6 = vsub.f32 %v373_v2, %v379_v5 }
  0xbb   : > { %v381_v7 = vmul.f32 %v380_v6, %v380_v6 }
  0xbd   : > { %v382_v8 = vsel %vm374_vm0, %v381_v7, 0.0 }
  0xbe   : > { %383 = vadd.xlane.f32.xlu0 %v382_v8 }
 0x14b   : > { %v384_v18 = vpop.xlane.xlu0 %383 }
 0x14c   : > { %v385_v19 = vmul.f32 0.03125, %v384_v18 }
 0x14e   : > { %v386_v21 = vadd.f32 1e-05, %v385_v19 }
 0x150   : > { %1931 = vrsqrt.f32 %v386_v21 }
 0x15a   : > { %v1932_v25 = vpop.eup %1931 }
 0x15b   : > { %v388_v26 = vmul.f32 %v1932_v25, %v380_v6 }
 0x15d   : > { %v395_v28 = vmul.f32 %v393_v24, %v388_v26 }
 0x15f   : > { %v402_v29 = vadd.f32 %v400_v27, %v395_v28 }
 0x161   : > { %1748 = vmatmul.mubr.msk.f32.vlgmr.msra.gmra.mrb[0].mxu0 %vm374_vm0, %v402_v29 }
 0x234   : > { %v476_v34 = vpop.f32.mrb[0].mxu0 }
 0x235   : > { %v484_v35 = vcombine.high %v476_v34, %v2064_v15  ;;  %v491_v36 = vrot.slane %v476_v34, %v490_v33  ;;  %481 = vrot.lane.b32.xlu1 %v476_v34, %s2067_s25  ;;  %v1749_v37 = vpop.f32.mrb[1].mxu0 }
 0x237   : > { %v498_v38 = vrot.slane %v484_v35, %v490_v33 }
 0x2a7   : > { %v482_v42 = vpop.permute.xlu1 %481 }
 0x2a8   : > { %v499_v44 = vcombine.high %v482_v42, %v2064_v15  ;;  %v506_v45 = vrot.slane %v482_v42, %v490_v33 }
 0x2aa   : > { %v513_v46 = vrot.slane %v499_v44, %v490_v33  ;;  %v514_v47 = vcombine.low %v491_v36, %v506_v45  ;;  %v515_v48 = vcombine.high %v491_v36, %v506_v45 }
 0x2ac   : > { %v522_v49 = vrot.slane %v514_v47, %v521_v43  ;;  %v529_v50 = vrot.slane %v515_v48, %v521_v43  ;;  %v530_v51 = vcombine.low %v498_v38, %v513_v46  ;;  %v531_v52 = vcombine.high %v498_v38, %v513_v46 }
 0x2ae   : > { %v538_v53 = vrot.slane %v530_v51, %v521_v43  ;;  %v545_v54 = vrot.slane %v531_v52, %v521_v43  ;;  %v550_v55 = vcombine.low %v522_v49, %v529_v50  ;;  %v1689_v56 = vcombine.high %v522_v49, %v529_v50 }
 0x2b0   : > { %v557_v57 = vrot.slane %v550_v55, %v490_v33  ;;  %v565_v58 = vrot.slane %v1689_v56, %v490_v33  ;;  %v566_v59 = vcombine.low %v538_v53, %v545_v54  ;;  %v1690_v60 = vcombine.high %v538_v53, %v545_v54 }
 0x2b2   : > { %v573_v61 = vrot.slane %v566_v59, %v490_v33  ;;  %v581_v62 = vrot.slane %v1690_v60, %v490_v33  ;;  %v582_v63 = vcombine.low %v557_v57, %v565_v58 }
 0x2b4   : > { %v589_v2 = vrot.slane %v582_v63, %v521_v43  ;;  %v590_v3 = vcombine.low %v573_v61, %v581_v62 }
 0x2b6   : > { %v597_v4 = vrot.slane %v590_v3, %v521_v43 }
 0x2b8   : > { %v598_v5 = vcombine.low %v589_v2, %v597_v4  ;;  %v599_v6 = vcombine.high %v589_v2, %v597_v4 }
 0x2ba   : > { %600 = vst.msk [vmem:[#allocation2] sm:$0xff] %vm374_vm0, %v598_v5  ;;  %601 = vst.msk [vmem:[#allocation2 + $0x8] sm:$0xff] %vm374_vm0, %v599_v6 }
 0x2bb PF: > { %v609_v7 = vld [vmem:[%s2240_s15] sm:$0xff]  ;;  %vm610_vm3 = vcmask 261120   ;;  %v640_v15 = vld [vmem:[%s2472_s5 + $0x8] sm:$0xff]  ;;  %v641_v16 = vld [vmem:[%s2472_s5 + $0x10] sm:$0xff]  ;;  %v2069_v17 = vmov 0.0|0.0   ;;  %vm2070_vm4 = vmmov 0   ;;  %v626_v24 = vlaneseq }
 0x2bc   : > { %v611_v8 = vsel %vm610_vm3, %v609_v7, 0.0  ;;  %v639_v14 = vld [vmem:[%s2472_s5] sm:$0xff]  ;;  %1806 = vmatprep.subr.bf16.mxu0 %v2069_v17  ;;  %v642_v19 = vld [vmem:[%s2472_s5 + $0x18] sm:$0xff]  ;;  %v2071_v20 = vmov 0.0   ;;  %s2072_s12 = smov 96   ;;  %vm1114_vm5 = vcmask 64512  }
 0x2bd   : > { %612 = vadd.xlane.f32.xlu0 %v611_v8  ;;  %v1807_v18 = vpack.c.bf16 %v640_v15, %v639_v14  ;;  %1758 = vmatprep.mubr.msk.f32.mxu0 %vm2070_vm4, %v2071_v20  ;;  %v1810_v21 = vpack.c.bf16 %v642_v19, %v641_v16  ;;  %v627_v26 = vshrl.u32 %v626_v24, 7  ;;  %v2073_v36 = vmov 1983009808   ;;  %s2076_s13 = smov 64   ;;  %p1702_p3 = scmp.ne.s32.totalorder %s2036_s30, 1 }
 0x2be   : > { %1761 = vmatprep.subr.mxu1 %v2071_v20  ;;  %1763 = vmatprep.mubr.msk.f32.mxu1 %vm2070_vm4, %v2071_v20  ;;  %v722_v37 = vunpack.c.l.s4 %v2073_v36  ;;  %v2074_v38 = vmov 1934713408   ;;  %vm1157_vm6 = vcmask 7168   ;;  %vm2080_vm7 = vmmov (!%p1702_p3), 0   ;;  %s2081_s19 = smov (!%p1702_p3), 32  }
 0x2bf   : > { %1808 = vmatpush3.bf16.msra.mxu0 %v1807_v18  ;;  %v628_v27 = vsub.s32 0, %v627_v26  ;;  %v753_v39 = vunpack.c.l.s4 %v2074_v38  ;;  %v1112_v18 = vld [vmem:[#allocation3] sm:$0xff]  ;;  %vm1484_vm8 = vcmask (!%p1702_p3), 523264  }
 0x2c0   : > { %1809 = vmatprep.subr.bf16.mxu0 %v2069_v17  ;;  %v2075_v17 = vmov 0  }
 0x2c1   : > { %v629_v28 = vrot.slane %v2218_v0, %v628_v27  ;;  %v636_v31 = vrot.slane %v2223_v1, %v628_v27  ;;  %v723_v0 = vunpack.c.0.s8 %v722_v37  ;;  %v754_v1 = vunpack.c.0.s8 %v753_v39  ;;  %v958_v8 = vld [vmem:[#allocation2] sm:$0xff]  ;;  %1933 = vset.pattern.permute.xlu0 %v2075_v17  ;;  %1934 = vset.pattern.permute.xlu1 %v2075_v17 }
 0x2c3   : > { %1811 = vmatpush3.bf16.msra.mxu0 %v1810_v21  ;;  %v2294_v40 = vsub.s32 %v723_v0, %v627_v26  ;;  %v2300_v43 = vsub.s32 %v754_v1, %v627_v26 }
 0x2c4   : > { %1771 = vmatprep.subr.mxu0 %v2071_v20 }
 0x34a   : > { %v613_v9 = vpop.xlane.xlu0 %612 }
 0x34b   : > { %v615_v10 = vmul.f32 0.03125, %v613_v9 }
 0x34d   : > { %v616_v11 = vsub.f32 %v609_v7, %v615_v10  ;;  %v959_v10 = vld [vmem:[#allocation2 + $0x8] sm:$0xff] }
 0x34f   : > { %v617_v12 = vmul.f32 %v616_v11, %v616_v11 }
 0x351   : > { %v618_v13 = vsel %vm610_vm3, %v617_v12, 0.0 }
 0x352   : > { %619 = vadd.xlane.f32.xlu0 %v618_v13 }
 0x3df   : > { %v620_v22 = vpop.xlane.xlu0 %619 }
 0x3e0   : > { %v621_v23 = vmul.f32 0.03125, %v620_v22  ;;  %v1113_v22 = vld [vmem:[#allocation3 + $0x8] sm:$0xff] }
 0x3e2   : > { %v622_v25 = vadd.f32 1e-05, %v621_v23 }
 0x3e4   : > { %1935 = vrsqrt.f32 %v622_v25 }
 0x3ee   : > { %v1936_v29 = vpop.eup %1935 }
 0x3ef   : > { %v624_v30 = vmul.f32 %v1936_v29, %v616_v11 }
 0x3f1   : > { %v631_v32 = vmul.f32 %v629_v28, %v624_v30 }
 0x3f3   : > { %v638_v33 = vadd.f32 %v636_v31, %v631_v32 }
 0x3f5   : > { %1759 = vmatmul.mubr.msk.f32.vlgmr.msra.gmra.mrb[0].mxu0 %vm610_vm3, %v638_v33 }
 0x3f6   : > { %1773 = vmatprep.mubr.msk.f32.mxu0 %vm2070_vm4, %v2071_v20 }
 0x4c8   : > { %v2291_v34 = vpop.f32.mrb[0].mxu0 }
 0x4c9   : > { %717 = vrot.lane.b32.xlu1 %v2291_v34, %s2072_s12  ;;  %v1760_v35 = vpop.f32.mrb[1].mxu0  ;;  %v720_v41 = vcombine.high %v2291_v34, %v2071_v20  ;;  %v727_v44 = vrot.slane %v2291_v34, %v2294_v40 }
 0x4cb   : > { %v734_v47 = vrot.slane %v720_v41, %v2294_v40 }
 0x53b   : > { %v2298_v42 = vpop.permute.xlu1 %717 }
 0x53c   : > { %v735_v45 = vcombine.high %v2298_v42, %v2071_v20  ;;  %v742_v46 = vrot.slane %v2298_v42, %v2294_v40 }
 0x53e   : > { %v749_v48 = vrot.slane %v735_v45, %v2294_v40  ;;  %v750_v49 = vcombine.low %v727_v44, %v742_v46  ;;  %v751_v50 = vcombine.high %v727_v44, %v742_v46 }
 0x540   : > { %v758_v51 = vrot.slane %v750_v49, %v2300_v43  ;;  %v765_v52 = vrot.slane %v751_v50, %v2300_v43  ;;  %v766_v53 = vcombine.low %v734_v47, %v749_v48  ;;  %v767_v54 = vcombine.high %v734_v47, %v749_v48 }
 0x542   : > { %v774_v55 = vrot.slane %v766_v53, %v2300_v43  ;;  %v781_v56 = vrot.slane %v767_v54, %v2300_v43  ;;  %v786_v57 = vcombine.low %v758_v51, %v765_v52  ;;  %v1692_v58 = vcombine.high %v758_v51, %v765_v52 }
 0x544   : > { %v802_v59 = vcombine.low %v774_v55, %v781_v56  ;;  %v1693_v60 = vcombine.high %v774_v55, %v781_v56  ;;  %v793_v61 = vrot.slane %v786_v57, %v2294_v40  ;;  %v801_v62 = vrot.slane %v1692_v58, %v2294_v40 }
 0x546   : > { %v809_v63 = vrot.slane %v802_v59, %v2294_v40  ;;  %v817_v2 = vrot.slane %v1693_v60, %v2294_v40  ;;  %v818_v3 = vcombine.low %v793_v61, %v801_v62 }
 0x548   : > { %v826_v4 = vcombine.low %v809_v63, %v817_v2  ;;  %v825_v5 = vrot.slane %v818_v3, %v2300_v43 }
 0x54a   : > { %v833_v6 = vrot.slane %v826_v4, %v2300_v43 }
 0x54c   : > { %v834_v7 = vcombine.low %v825_v5, %v833_v6  ;;  %v835_v9 = vcombine.high %v825_v5, %v833_v6 }
 0x54e   : > { %1762 = vmatpush3.xpose.msk.msra.mxu1 %vm610_vm3, %v834_v7 }
 0x54f   : > { %1766 = vmatprep.subr.mxu1 %v2071_v20 }
 0x551   : > { %1764 = vmatmul.mubr.msk.f32.vlgmr.msra.gmra.mrb[0].mxu1 %vm610_vm3, %v958_v8  ;;  %v1145_v8 = vld [vmem:[#allocation4] sm:$0xff] }
 0x552   : > { %1767 = vmatpush3.xpose.msk.msra.mxu1 %vm610_vm3, %v835_v9  ;;  %1768 = vmatprep.mubr.msk.f32.mxu1 %vm2070_vm4, %v2071_v20 }
 0x553   : > { %1776 = vmatprep.subr.mxu1 %v2071_v20 }
 0x555   : > { %1769 = vmatmul.mubr.msk.f32.vlgmr.msra.gmra.mrb[2].mxu1 %vm610_vm3, %v959_v10 }
 0x556   : > { %1778 = vmatprep.mubr.msk.f32.mxu1 %vm2070_vm4, %v2071_v20 }
 0x624   : > { %v1032_v11 = vpop.f32.mrb[0].mxu1 }
 0x625   : > { %v1765_v12 = vpop.f32.mrb[1].mxu1  ;;  %v1115_v13 = vsel %vm1114_vm5, %v1032_v11, -inf }
 0x626   : > { %1116 = vmax.xlane.f32.xlu1 %v1115_v13 }
 0x628   : > { %v1108_v14 = vpop.f32.mrb[2].mxu1 }
 0x629   : > { %v1770_v15 = vpop.f32.mrb[3].mxu1  ;;  %v1118_v16 = vsel %vm1114_vm5, %v1108_v14, -inf }
 0x62a   : > { %1119 = vmax.xlane.f32.xlu0 %v1118_v16  ;;  %v1161_v16 = vld [vmem:[#allocation5 + $0x8] sm:$0xff] }
 0x6b3   : > { %v1117_v19 = vpop.xlane.xlu1 %1116 }
 0x6b4   : > { %v1121_v21 = vmax.f32 %v1112_v18, %v1117_v19 }
 0x6b6   : > { %v1123_v23 = vsub.f32 %v1112_v18, %v1121_v21  ;;  %1324 = vst.msk [vmem:[#allocation3] sm:$0xff] %vm1157_vm6, %v1121_v21  ;;  %1131 = vperm.xlu0 %1933, %v1121_v21   ;;  %v1160_v18 = vld [vmem:[#allocation5] sm:$0xff] }
 0x6b7   : > { %v1120_v24 = vpop.xlane.xlu0 %1119 }
 0x6b8   : > { %v1122_v25 = vmax.f32 %v1113_v22, %v1120_v24  ;;  %v1125_v3 = vmul.f32 1.442695, %v1123_v23 }
 0x6ba   : > { %v1124_v26 = vsub.f32 %v1113_v22, %v1122_v25  ;;  %1325 = vst.msk [vmem:[#allocation3 + $0x8] sm:$0xff] %vm1157_vm6, %v1122_v25  ;;  %836 = vrot.lane.b32.xlu0 %v2291_v34, %s2076_s13  ;;  %1136 = vperm.xlu1 %1934, %v1122_v25  }
 0x6bc   : > { %v1127_v62 = vmul.f32 1.442695, %v1124_v26 }
 0x6be   : > { %838 = vrot.lane.b32.xlu1 %v2298_v42, %s2076_s13 }
 0x735   : > { %v1132_v27 = vpop.permute.xlu0 %1131 }
 0x736   : > { %v1139_v28 = vsub.f32 %v1032_v11, %v1132_v27  ;;  %v1146_v11 = vld [vmem:[#allocation4 + $0x8] sm:$0xff] }
 0x738   : > { %v1141_v29 = vmul.f32 1.442695, %v1139_v28 }
 0x739   : > { %v1137_v30 = vpop.permute.xlu1 %1136  ;;  %v837_v31 = vpop.permute.xlu0 %836 }
 0x73a   : > { %1937 = vpow2.f32 %v1141_v29  ;;  %v1140_v32 = vsub.f32 %v1108_v14, %v1137_v30  ;;  %v842_v35 = vcombine.high %v837_v31, %v2071_v20  ;;  %v849_v37 = vrot.slane %v837_v31, %v2294_v40 }
 0x73b   : > { %v2077_v30 = vmov (!%p1702_p3), 0  }
 0x73c   : > { %v1143_v33 = vmul.f32 1.442695, %v1140_v32  ;;  %v856_v38 = vrot.slane %v842_v35, %v2294_v40  ;;  %v1469_v32 = vld [vmem:[%s2473_s6] sm:$0xff] (!%p1702_p3)  ;;  %v1471_v35 = vld [vmem:[%s2473_s6 + $0x10] sm:$0xff] (!%p1702_p3) }
 0x73d   : > { %v839_v36 = vpop.permute.xlu1 %838 }
 0x73e   : > { %1939 = vpow2.f32 %v1143_v33  ;;  %v857_v0 = vcombine.high %v839_v36, %v2071_v20  ;;  %v864_v34 = vrot.slane %v839_v36, %v2294_v40  ;;  %v1470_v33 = vld [vmem:[%s2473_s6 + $0x8] sm:$0xff] (!%p1702_p3)  ;;  %v2078_v36 = vmov (!%p1702_p3), 0.0|0.0  }
 0x73f   : > { %1941 = vpow2.f32 %v1127_v62 }
 0x740   : > { %v871_v39 = vrot.slane %v857_v0, %v2294_v40  ;;  %v872_v1 = vcombine.low %v849_v37, %v864_v34  ;;  %v873_v41 = vcombine.high %v849_v37, %v864_v34  ;;  %1943 = vpow2.f32 %v1125_v3  ;;  %v1472_v0 = vld [vmem:[%s2473_s6 + $0x18] sm:$0xff] (!%p1702_p3) }
 0x741   : > { %v1813_v37 = vpack.c.bf16 (!%p1702_p3), %v1470_v33, %v1469_v32  ;;  %v1816_v34 = vpack.c.bf16 (!%p1702_p3), %v1472_v0, %v1471_v35 }
 0x742   : > { %v880_v42 = vrot.slane %v872_v1, %v2300_v43  ;;  %v887_v44 = vrot.slane %v873_v41, %v2300_v43  ;;  %v888_v45 = vcombine.low %v856_v38, %v871_v39  ;;  %v889_v46 = vcombine.high %v856_v38, %v871_v39  ;;  %v1473_v38 = vld [vmem:[%s2473_s6 + $0x20] sm:$0xff] (!%p1702_p3)  ;;  %v1474_v39 = vld [vmem:[%s2473_s6 + $0x28] sm:$0xff] (!%p1702_p3)  ;;  %v1475_v41 = vld [vmem:[%s2473_s6 + $0x30] sm:$0xff] (!%p1702_p3) }
 0x743   : > { %v1819_v1 = vpack.c.bf16 (!%p1702_p3), %v1474_v39, %v1473_v38 }
 0x744   : > { %v1938_v47 = vpop.eup %1937  ;;  %v896_v48 = vrot.slane %v888_v45, %v2300_v43  ;;  %v903_v49 = vrot.slane %v889_v46, %v2300_v43  ;;  %v908_v20 = vcombine.low %v880_v42, %v887_v44  ;;  %v1694_v50 = vcombine.high %v880_v42, %v887_v44  ;;  %v1476_v42 = vld [vmem:[%s2473_s6 + $0x38] sm:$0xff] (!%p1702_p3) }
 0x745   : > { %v1149_v51 = vsel %vm1114_vm5, %v1938_v47, 0.0  ;;  %v1822_v44 = vpack.c.bf16 (!%p1702_p3), %v1476_v42, %v1475_v41 }
 0x746   : > { %v915_v52 = vrot.slane %v908_v20, %v2294_v40  ;;  %v923_v53 = vrot.slane %v1694_v50, %v2294_v40  ;;  %v924_v54 = vcombine.low %v896_v48, %v903_v49  ;;  %v1695_v55 = vcombine.high %v896_v48, %v903_v49  ;;  %1150 = vadd.xlane.f32.xlu0 %v1149_v51 }
 0x748   : > { %v1940_v56 = vpop.eup %1939  ;;  %v931_v57 = vrot.slane %v924_v54, %v2294_v40  ;;  %v939_v58 = vrot.slane %v1695_v55, %v2294_v40  ;;  %v940_v59 = vcombine.low %v915_v52, %v923_v53  ;;  %v2079_v52 = vmov (!%p1702_p3), 0.0  }
 0x749   : > { %v1152_v60 = vsel %vm1114_vm5, %v1940_v56, 0.0  ;;  %v1942_v6 = vpop.eup %1941 }
 0x74a   : > { %1153 = vadd.xlane.f32.xlu1 %v1152_v60  ;;  %v948_v61 = vcombine.low %v931_v57, %v939_v58  ;;  %v947_v63 = vrot.slane %v940_v59, %v2300_v43  ;;  %v1944_v7 = vpop.eup %1943  ;;  %v1148_v13 = vmul.f32 %v1942_v6, %v1146_v11 }
 0x74b   : > { %v1147_v9 = vmul.f32 %v1944_v7, %v1145_v8 }
 0x74c   : > { %v955_v2 = vrot.slane %v948_v61, %v2300_v43 }
 0x74e   : > { %v956_v4 = vcombine.low %v947_v63, %v955_v2  ;;  %v957_v5 = vcombine.high %v947_v63, %v955_v2 }
 0x750   : > { %1772 = vmatpush3.msra.mxu0 %v956_v4  ;;  %1777 = vmatpush3.msra.mxu1 %v957_v5 }
 0x751   : > { %1774 = vmatmul.mubr.msk.f32.vlgmr.msra.gmra.mrb[2].mxu0 %vm1114_vm5, %v1938_v47  ;;  %1779 = vmatmul.mubr.msk.f32.vlgmr.msra.gmra.mrb[4].mxu1 %vm1114_vm5, %v1940_v56 }
 0x752   : > { %1812 = vmatprep.subr.bf16.mxu0 (!%p1702_p3), %v2078_v36  ;;  %1797 = vmatprep.mubr.msk.f32.mxu0 (!%p1702_p3), %vm2080_vm7, %v2079_v52 }
 0x753   : > { %1814 = vmatpush3.bf16.msra.mxu0 (!%p1702_p3), %v1813_v37 }
 0x754   : > { %1815 = vmatprep.subr.bf16.mxu0 (!%p1702_p3), %v2078_v36 }
 0x757   : > { %1817 = vmatpush3.bf16.msra.mxu0 (!%p1702_p3), %v1816_v34 }
 0x758   : > { %1818 = vmatprep.subr.bf16.mxu0 (!%p1702_p3), %v2078_v36 }
 0x75b   : > { %1169 = vperm.xlu1 %1934, %v1942_v6   ;;  %1820 = vmatpush3.bf16.msra.mxu0 (!%p1702_p3), %v1819_v1 }
 0x75c   : > { %1164 = vperm.xlu0 %1933, %v1944_v7   ;;  %1821 = vmatprep.subr.bf16.mxu0 (!%p1702_p3), %v2078_v36 }
 0x75f   : > { %1823 = vmatpush3.bf16.msra.mxu0 (!%p1702_p3), %v1822_v44 }
 0x760   : > { %1945 = vset.pattern.permute.xlu0 (!%p1702_p3), %v2077_v30 }
 0x7d3   : > { %v1151_v10 = vpop.xlane.xlu0 %1150 }
 0x7d4   : > { %v1155_v12 = vadd.f32 %v1151_v10, %v1147_v9 }
 0x7d6   : > { %1158 = vst.msk [vmem:[#allocation4] sm:$0xff] %vm1157_vm6, %v1155_v12 }
 0x7d7   : > { %v1154_v14 = vpop.xlane.xlu1 %1153 }
 0x7d8   : > { %v1156_v15 = vadd.f32 %v1154_v14, %v1148_v13 }
 0x7da   : > { %1159 = vst.msk [vmem:[#allocation4 + $0x8] sm:$0xff] %vm1157_vm6, %v1156_v15 }
 0x7db   : > { %v1170_v17 = vpop.permute.xlu1 %1169  ;;  %v1165_v19 = vpop.permute.xlu0 %1164 }
 0x7dc   : > { %v1173_v21 = vmul.f32 %v1170_v17, %v1161_v16  ;;  %v1172_v22 = vmul.f32 %v1165_v19, %v1160_v18 }
 0x7dd   : > { %v1332_v29 = vld [vmem:[#allocation4] sm:$0xff] (!%p1702_p3) }
 0x7de   : > { %1336 = vperm.xlu0 (!%p1702_p3), %1945, %v1332_v29  }
 0x7e1   : > { %v1333_v31 = vld [vmem:[#allocation4 + $0x8] sm:$0xff] (!%p1702_p3) }
 0x7e2   : > { %1341 = vperm.xlu0 (!%p1702_p3), %1945, %v1333_v31  }
 0x821   : > { %1329 = sbr.rel (%p1702_p3) target bundleno = 2508 (0x9cc), region = 60 }
 0x824   : > { %v1243_v23 = vpop.f32.mrb[2].mxu0  ;;  %v1316_v24 = vpop.f32.mrb[4].mxu1 }
 0x825   : > { %v1320_v25 = vadd.f32 %v1243_v23, %v1172_v22  ;;  %v1321_v26 = vadd.f32 %v1316_v24, %v1173_v21  ;;  %v1775_v27 = vpop.f32.mrb[3].mxu0  ;;  %v1780_v28 = vpop.f32.mrb[5].mxu1 }
 0x827   : > { %1322 = vst.msk [vmem:[#allocation5] sm:$0xff] %vm610_vm3, %v1320_v25  ;;  %1323 = vst.msk [vmem:[#allocation5 + $0x8] sm:$0xff] %vm610_vm3, %v1321_v26 }
 0x82e   : > { %v1330_v47 = vld [vmem:[#allocation5] sm:$0xff]  ;;  %v1331_v20 = vld [vmem:[#allocation5 + $0x8] sm:$0xff] }
 0x85d   : > { %v1337_v45 = vpop.permute.xlu0 %1336 }
 0x85e   : > { %1946 = vrcp.f32 %v1337_v45 }
 0x861   : > { %v1342_v46 = vpop.permute.xlu0 %1341 }
 0x862   : > { %1948 = vrcp.f32 %v1342_v46 }
 0x868   : > { %v1947_v48 = vpop.eup %1946 }
 0x869   : > { %v1345_v49 = vmul.f32 %v1947_v48, %v1330_v47 }
 0x86b   : > { %v1348_v53 = vcombine.high %v1345_v49, %v2079_v52  ;;  %v1355_v54 = vrot.slane %v1345_v49, %v2294_v40 }
 0x86c   : > { %v1949_v50 = vpop.eup %1948 }
 0x86d   : > { %v1347_v51 = vmul.f32 %v1949_v50, %v1331_v20  ;;  %v1362_v57 = vrot.slane %v1348_v53, %v2294_v40 }
 0x86f   : > { %v1363_v55 = vcombine.high %v1347_v51, %v2079_v52  ;;  %v1370_v56 = vrot.slane %v1347_v51, %v2294_v40 }
 0x871   : > { %v1377_v58 = vrot.slane %v1363_v55, %v2294_v40  ;;  %v1378_v59 = vcombine.low %v1355_v54, %v1370_v56  ;;  %v1379_v60 = vcombine.high %v1355_v54, %v1370_v56 }
 0x873   : > { %v1386_v61 = vrot.slane %v1378_v59, %v2300_v43  ;;  %v1393_v62 = vrot.slane %v1379_v60, %v2300_v43  ;;  %v1394_v63 = vcombine.low %v1362_v57, %v1377_v58  ;;  %v1395_v2 = vcombine.high %v1362_v57, %v1377_v58 }
 0x875   : > { %v1402_v3 = vrot.slane %v1394_v63, %v2300_v43  ;;  %v1409_v4 = vrot.slane %v1395_v2, %v2300_v43  ;;  %v1414_v5 = vcombine.low %v1386_v61, %v1393_v62  ;;  %v1703_v6 = vcombine.high %v1386_v61, %v1393_v62 }
 0x877   : > { %v1421_v7 = vrot.slane %v1414_v5, %v2294_v40  ;;  %v1429_v8 = vrot.slane %v1703_v6, %v2294_v40  ;;  %v1430_v9 = vcombine.low %v1402_v3, %v1409_v4  ;;  %v1704_v10 = vcombine.high %v1402_v3, %v1409_v4 }
 0x879   : > { %v1437_v11 = vrot.slane %v1430_v9, %v2294_v40  ;;  %v1445_v12 = vrot.slane %v1704_v10, %v2294_v40  ;;  %v1446_v13 = vcombine.low %v1421_v7, %v1429_v8  ;;  %v1705_v40 = vld [vmem:[%s2474_s7] ss:$0 sm:$0xff] }
 0x87b   : > { %v1454_v14 = vcombine.low %v1437_v11, %v1445_v12  ;;  %v1453_v15 = vrot.slane %v1446_v13, %v2300_v43 }
 0x87d   : > { %v1461_v16 = vrot.slane %v1454_v14, %v2300_v43 }
 0x87f   : > { %v1463_v17 = vcombine.high %v1453_v15, %v1461_v16  ;;  %v1462_v18 = vcombine.low %v1453_v15, %v1461_v16 }
 0x881   : > { %1465 = vrot.lane.b32.xlu1 %v1463_v17, %s2081_s19 }
 0x8f3   : > { %v1466_v19 = vpop.permute.xlu1 %1465 }
 0x8f4   : > { %v1468_v21 = vsel %vm610_vm3, %v1462_v18, %v1466_v19 }
 0x8f5   : > { %1798 = vmatmul.mubr.msk.f32.vlgmr.msra.gmra.mrb[0].mxu0 %vm1484_vm8, %v1468_v21 }
 0x9c8   : > { %v1554_v22 = vpop.f32.mrb[0].mxu0 }
 0x9c9   : > { %v1555_v23 = vadd.f32 %v1705_v40, %v1554_v22  ;;  %v1799_v24 = vpop.f32.mrb[1].mxu0 }
 0x9cb   : > { %1558 = vst.msk [vmem:[%s350_s29] sm:$0xff] %vm610_vm3, %v1555_v23 }
 0x9cc PF: > { %s1708_s18 = sshll.u32 %s2044_s10, 1  ;;  %s1575_s30 = sshll.u32 %s350_s29, 4  ;;  %s2410_s30 = int_to_ptr.vmem [resolvable:$true] %s1575_s30 }
 0x9cd   : > { %s1571_s16 = sadd.s32 %s2040_s9, %s1708_s18  ;;  %s2497_s3 = sand.u32 1, %s2028_s28  }
 0x9ce   : > { %s1709_s22 = sshll.u32 %s1571_s16, 7  ;;  %s1560_s11 = scalar_lea.sflag [#allocation7], %s2497_s3 }
 0x9cf   : > { %s1573_s2 = scalar_lea.hbm %s2475_s8, %s1709_s22  ;;  %s1950_s12 = scalar_lea.vmem %s2410_s30, 128 }
 0x9d0   : > { %p1951_p4 = scmp.ne.s32.totalorder %s2410_s30, %s1950_s12  ;;  %s2082_s9 = smov [#allocation6]  }
 0x9d1   : > { %s1954_s10 = sshll.u32 %s2082_s9, 4  ;;  %s1955_s10 = int_to_ptr.vmem [resolvable:$false] %s1954_s10 }
 0x9d2   : > { %p1952_p5 = pnand %p1951_p4, %p2190_p6  ;;  %s1956_s29 = scalar_lea.vmem %s1955_s10, 256 }
 0x9d3   : > { %p1957_p9 = scmp.lt.s32.totalorder %s2410_s30, %s1955_s10  ;;  %p1958_p10 = scmp.lt.s32.totalorder %s1956_s29, %s1950_s12 }
 0x9d4   : > { %p1953_p8 = pneg %p1952_p5 }
 0x9d5   : > { %p1959_p11 = por %p1958_p10, %p1957_p9 }
 0x9d7   : > { %p1960_p12 = pnand %p1959_p11, %p1953_p8 }
 0x9d9   : > { %1963 = shalt.err (!%p1960_p12)
}
 0x9da   : > { %s1964_s24 = scalar_lea.hbm %s1573_s2, 128  ;;  %s1968_s19 = scalar_lea.hbm %s2475_s8, 512 }
 0x9db   : > { %p1965_p13 = scmp.ne.s32.totalorder %s1573_s2, %s1964_s24  ;;  %p1969_p2 = scmp.lt.u32.totalorder %s1573_s2, %s2475_s8 }
 0x9dc   : > { %p1970_p3 = scmp.lt.u32.totalorder %s1968_s19, %s1964_s24  ;;  %p1972_p5 = scmp.lt.u32.totalorder %s1964_s24, %s1573_s2 }
 0x9dd   : > { %p1966_p0 = pnand %p1965_p13, %p2190_p6 }
 0x9de   : > { %p1971_p4 = por %p1970_p3, %p1969_p2 }
 0x9df   : > { %p1967_p1 = pneg %p1966_p0 }
 0x9e0   : > { %p1973_p9 = por %p1972_p5, %p1971_p4 }
 0x9e2   : > { %p1974_p8 = pnand %p1973_p9, %p1967_p1 }
 0x9e4   : > { %1977 = shalt.err (!%p1974_p8)
}
 0x9e5   : > { %1824 = dma.vmem_to_hbm [thread:$0]  (%p2190_p6), %s2410_s30, 128, %s1573_s2, %s1560_s11  }
 0x9e6 PF: > { %p1830_p10 = scmp.ge.s32.totalorder %s2060_s14, 2  ;;  %s1587_s18 = sand.u32 1, %s2024_s27  }
 0x9e7   : > { %s1588_s16 = scalar_lea.sflag [#allocation7], %s1587_s18 }
 0x9e8   : > { %p1827_p11 = pnand %p1830_p10, %p2197_p7 }
 0x9ea   : > { %2019 = dma.done.wait (!%p1827_p11), %s1588_s16, 128  }
 0x9eb   : > { %2021 = vsyncadd (!%p1827_p11), %s1588_s16, 4294967168  ;;  %s21_s14 = sadd.s32 1, %s2060_s14   ;;  %s2498_s22 = sld [smem:[#allocation9_spill]] }
 0x9ec   : > { %p18_p12 = scmp.ge.s32.totalorder %s21_s14, 10   ;;  %s2499_s29 = sld [smem:[#allocation16_spill]] }
 0x9ed   : > { %s2500_s30 = sld [smem:[#allocation10_spill]]  ;;  %s2501_s9 = sld [smem:[#allocation11_spill]] }
 0x9ee   : > { %s2502_s10 = sld [smem:[#allocation12_spill]]  ;;  %s2503_s11 = sld [smem:[#allocation13_spill]] }
 0x9ef   : > { %s2504_s12 = sld [smem:[#allocation14_spill]]  ;;  %s2505_s13 = sld [smem:[#allocation15_spill]] }
 0x9f0   : > { %s2506_s27 = smov %s2028_s28  ;;  %20 = sbr.rel (!%p18_p12) target bundleno = 9 (0x9), region = 98 }
 0x9f1   : > { %s2507_s28 = smov %s2498_s22 }
 0x9f7   :  { %1593 = vsyncpa [#allocation7], 1 }
 0x9f8   :  { %1595 = vsyncpa [#allocation7 + $0x1], 1 }

</bundles_post_ra>
